<compile_context>
chip_gen: v5e
topology: v5e:2x2
jax: 0.10.0
libtpu: 0.0.40
codegen_flags: <defaults>
</compile_context>

<pallas_src>
import jax
import jax.numpy as jnp
from jax.experimental import pallas as pl
from jax.experimental.pallas import tpu as pltpu


def _round_up(x, m):
    return ((x + m - 1) // m) * m


def _num_tensorcores():
    """2 on v7x-class chips (megacore-style dual TensorCore), else 1."""
    try:
        kind = jax.devices()[0].device_kind.lower()
    except Exception:
        return 1
    if "v7" in kind or "tpu7" in kind:
        return 2
    return 1


# ---------------------------------------------------------------------------
# Kernel A: per-core partial sum of h over the node axis.
#   h2d is [N_pad, P*D]; grid = (split, steps).  The leading "parallel" axis
#   shards node tiles across TensorCores; the trailing "arbitrary" axis
#   accumulates into an [8, PD] f32 scratch (pure VALU vreg adds).  The single
#   cross-sublane reduce happens once per core in the last-step epilogue.
# ---------------------------------------------------------------------------
def _zphi_kernel(h_ref, zphi_ref, acc_ref):
    step = pl.program_id(1)

    @pl.when(step == 0)
    def _():
        acc_ref[...] = jnp.zeros_like(acc_ref)

    x = h_ref[...].astype(jnp.float32)                      # [tile_n, PD]
    # Fold rows into 8 sublane-aligned partial rows: whole-vreg adds, no
    # per-step cross-sublane reduction (reshape is layout-free: PD is a
    # multiple of 128 and tile_n a multiple of 8).
    acc_ref[...] += jnp.sum(x.reshape(-1, 8, x.shape[-1]), axis=0)

    @pl.when(step == pl.num_programs(1) - 1)
    def _():
        zphi_ref[...] = jnp.sum(acc_ref[...], axis=0, keepdims=True)[None, ...]


# ---------------------------------------------------------------------------
# Kernel B: fused (beta-weighted sum over edge types + fc2) as one lane-dense
#   MXU matmul.  beta has been folded into M[p*D+d, o] = beta[p] * W_fc2[o, d]
#   on the host side, so per tile this is just  out_tile = h2d_tile @ M.
#   h may arrive as bf16; it is upcast in VMEM (VPU has huge slack) and the
#   matmul accumulates in f32.
# ---------------------------------------------------------------------------
def _proj_kernel(h_ref, m_ref, out_ref):
    out_ref[...] = jnp.dot(
        h_ref[...].astype(jnp.float32), m_ref[...],
        preferred_element_type=jnp.float32,
    ).astype(out_ref.dtype)


def sem_level_gat_forward(h, w_attn, w_fc2, *,
                          h_compute_dtype=jnp.bfloat16,
                          max_tile_n=16384,
                          h_tile_budget_bytes=8 << 20,
                          split=None):
    """h: [N, P, D]; w_attn: [1, D]; w_fc2: [out_dim, D]  ->  [N, out_dim] (f32).

    h_compute_dtype: dtype h is streamed from HBM in (bf16 halves traffic);
                     None keeps h's own dtype.  Accumulation is always f32.
    """
    N, P, D = h.shape
    out_dim = w_fc2.shape[0]
    PD = P * D

    h2d = h.reshape(N, PD)                         # free, contiguous last dims
    if h_compute_dtype is not None and h2d.dtype != jnp.dtype(h_compute_dtype):
        h2d = h2d.astype(h_compute_dtype)
    itemsize = jnp.dtype(h2d.dtype).itemsize
    sub = 16 if itemsize < 4 else 8                # sublane packing granularity

    # --- core split: 2 only on dual-TensorCore chips (v7x) ------------------
    if split is None:
        split = _num_tensorcores()
    split = max(1, int(split))

    # --- node-tile sizing: large, budgeted, sublane-aligned -----------------
    cap = max(sub, (h_tile_budget_bytes // (PD * itemsize)) // sub * sub)
    per_core = _round_up(max(1, -(-N // split)), sub)
    tile_n = int(min(max_tile_n, cap, per_core))
    tile_n = max(sub, tile_n // sub * sub)
    steps = -(-per_core // tile_n)                 # grid steps per core
    n_pad = split * steps * tile_n

    if n_pad != N:
        # zero rows contribute nothing to zphi and give zero output rows
        h2d = jnp.pad(h2d, ((0, n_pad - N), (0, 0)))

    # --- VMEM budget: double-buffered h + out tiles + m, with headroom ------
    h_tile_b = tile_n * PD * itemsize
    out_tile_b = tile_n * out_dim * 4
    needed = 2 * h_tile_b + 2 * out_tile_b + 2 * PD * out_dim * 4 + (1 << 20)
    vmem_limit = int(min(48 << 20,                              # v7x headroom
                         max(16 << 20,                          # never below v5e default
                             _round_up(needed, 1 << 20) + (4 << 20))))

    cparams_p1 = pltpu.CompilerParams(
        dimension_semantics=("parallel", "arbitrary"),
        vmem_limit_bytes=vmem_limit)
    cparams_p2 = pltpu.CompilerParams(
        dimension_semantics=("parallel", "parallel"),
        vmem_limit_bytes=vmem_limit)

    # --- pass 1: zphi = sum_n h[n], one partial per core --------------------
    zphi_parts = pl.pallas_call(
        _zphi_kernel,
        out_shape=jax.ShapeDtypeStruct((split, 1, PD), jnp.float32),
        grid_spec=pltpu.PrefetchScalarGridSpec(
            num_scalar_prefetch=0,
            grid=(split, steps),
            in_specs=[
                pl.BlockSpec((tile_n, PD), lambda c, i: (c * steps + i, 0)),
            ],
            out_specs=pl.BlockSpec((1, 1, PD), lambda c, i: (c, 0, 0)),
            scratch_shapes=[pltpu.VMEM((8, PD), jnp.float32)],
        ),
        compiler_params=cparams_p1,
    )(h2d)

    # --- tiny epilogue in plain JAX: semantic attention over P edge types ---
    wa = jnp.asarray(w_attn, jnp.float32)                            # [1, D]
    w2t = jnp.asarray(w_fc2, jnp.float32).T                          # [D, out_dim]
    zphi = jnp.sum(zphi_parts, axis=(0, 1)).reshape(P, D)            # [P, D]
    w_phi = zphi @ wa.T                                              # [P, 1]
    w_phi = jnp.where(w_phi >= 0, w_phi, 0.01 * w_phi)               # leaky_relu
    beta = jax.nn.softmax(w_phi, axis=0)                             # [P, 1]

    # fold beta into fc2:  M[p*D+d, o] = beta[p] * w2t[d, o]
    m = (beta.reshape(P, 1, 1) * w2t[None, :, :]).reshape(PD, out_dim)

    # --- pass 2: one lane-dense MXU matmul per node tile, split over cores --
    out_pad = pl.pallas_call(
        _proj_kernel,
        out_shape=jax.ShapeDtypeStruct((n_pad, out_dim), jnp.float32),
        grid_spec=pltpu.PrefetchScalarGridSpec(
            num_scalar_prefetch=0,
            grid=(split, steps),
            in_specs=[
                pl.BlockSpec((tile_n, PD), lambda c, i: (c * steps + i, 0)),
                pl.BlockSpec((PD, out_dim), lambda c, i: (0, 0)),
            ],
            out_specs=pl.BlockSpec((tile_n, out_dim),
                                   lambda c, i: (c * steps + i, 0)),
        ),
        compiler_params=cparams_p2,
    )(h2d, m)

    return out_pad[:N]


def _reference(h, w_attn, w_fc2):
    zphi = jnp.sum(h, axis=0)                                   # [P, D]
    w_phi = zphi @ w_attn.T                                     # [P, 1]
    w_phi = jnp.where(w_phi >= 0, w_phi, 0.01 * w_phi)
    beta = jax.nn.softmax(w_phi, axis=0)                        # [P, 1]
    Z = jnp.sum(beta * h, axis=1)                               # [N, D]
    return Z @ w_fc2.T                                          # [N, out_dim]


if __name__ == "__main__":
    # Small shapes implied by the forward: N nodes, P edge types, D = z_node_lv_dim.
    N, P, D, OUT = 64, 4, 32, 16

    key = jax.random.PRNGKey(0)
    k_h, k_wa, k_w2 = jax.random.split(key, 3)

    h = jax.random.normal(k_h, (N, P, D), dtype=jnp.float32)
    # deterministic synthetic parameters (nn.Linear weights, bias=False)
    w_attn = jax.random.normal(k_wa, (1, D), dtype=jnp.float32) * (1.0 / jnp.sqrt(D))
    w_fc2 = jax.random.normal(k_w2, (OUT, D), dtype=jnp.float32) * (1.0 / jnp.sqrt(D))

    ref = _reference(h, w_attn, w_fc2)

    # exact f32-stream path (bit-close to reference)
    out_f32 = jax.block_until_ready(
        sem_level_gat_forward(h, w_attn, w_fc2, h_compute_dtype=None))
    assert out_f32.shape == (N, OUT)
    assert jnp.allclose(out_f32, ref, atol=1e-4, rtol=1e-4)

    # default bf16-h streaming path (halves HBM traffic; f32 accumulation)
    out_bf16 = jax.block_until_ready(sem_level_gat_forward(h, w_attn, w_fc2))
    assert out_bf16.shape == (N, OUT)
    assert jnp.allclose(out_bf16, ref, atol=2e-2, rtol=2e-2)

    print("KERNEL_OK")
</pallas_src>

<mosaic_0001>
module attributes {stable_mosaic.version = 11 : i64} {
  func.func @_zphi_kernel(%arg0: i32, %arg1: i32, %arg2: memref<64x128xf32, #tpu.memory_space<vmem>>, %arg3: memref<1x1x128xf32, #tpu.memory_space<vmem>>, %arg4: memref<8x128xf32, #tpu.memory_space<vmem>>) attributes {dimension_semantics = [#tpu.dimension_semantics<parallel>, #tpu.dimension_semantics<arbitrary>], iteration_bounds = array<i64: 1, 1>, scalar_prefetch = 0 : i64, scratch_operands = 1 : i64, tpu.core_type = #tpu.core_type<tc>, window_params = [{transform_indices = @transform_0, window_bounds = array<i64: 64, 128>}, {transform_indices = @transform_1, window_bounds = array<i64: 1, 1, 128>}]} {
    %c0_i32 = arith.constant 0 : i32
    %0 = arith.cmpi eq, %arg1, %c0_i32 : i32
    %1 = arith.extui %0 : i1 to i32
    %c0_i32_0 = arith.constant 0 : i32
    %2 = arith.cmpi ne, %1, %c0_i32_0 : i32
    scf.if %2 {
      %cst_8 = arith.constant 0.000000e+00 : f32
      %12 = vector.broadcast %cst_8 : f32 to vector<8x128xf32>
      %c0_9 = arith.constant 0 : index
      %c0_10 = arith.constant 0 : index
      %13 = vector.load %arg4[%c0_9, %c0_10] : memref<8x128xf32, #tpu.memory_space<vmem>>, vector<8x128xf32>
      tpu.vector_store %arg4[%c0_9, %c0_10], %12 {strides = array<i32>} : memref<8x128xf32, #tpu.memory_space<vmem>>, vector<8x128xf32>,
    } else {
    }
    %c0 = arith.constant 0 : index
    %c0_1 = arith.constant 0 : index
    %3 = vector.load %arg2[%c0, %c0_1] : memref<64x128xf32, #tpu.memory_space<vmem>>, vector<64x128xf32>
    %c0_2 = arith.constant 0 : index
    %c0_3 = arith.constant 0 : index
    %4 = vector.load %arg4[%c0_2, %c0_3] : memref<8x128xf32, #tpu.memory_space<vmem>>, vector<8x128xf32>
    %5 = vector.shape_cast %3 : vector<64x128xf32> to vector<8x8x128xf32>
    %cst = arith.constant dense<0.000000e+00> : vector<8x128xf32>
    %6 = vector.multi_reduction <add>, %5, %cst [0] : vector<8x8x128xf32> to vector<8x128xf32>
    %7 = arith.addf %4, %6 : vector<8x128xf32>
    %c0_4 = arith.constant 0 : index
    %c0_5 = arith.constant 0 : index
    %8 = vector.load %arg4[%c0_4, %c0_5] : memref<8x128xf32, #tpu.memory_space<vmem>>, vector<8x128xf32>
    tpu.vector_store %arg4[%c0_4, %c0_5], %7 {strides = array<i32>} : memref<8x128xf32, #tpu.memory_space<vmem>>, vector<8x128xf32>,
    %c0_i32_6 = arith.constant 0 : i32
    %9 = arith.cmpi eq, %arg1, %c0_i32_6 : i32
    %10 = arith.extui %9 : i1 to i32
    %c0_i32_7 = arith.constant 0 : i32
    %11 = arith.cmpi ne, %10, %c0_i32_7 : i32
    scf.if %11 {
      %c0_8 = arith.constant 0 : index
      %c0_9 = arith.constant 0 : index
      %12 = vector.load %arg4[%c0_8, %c0_9] : memref<8x128xf32, #tpu.memory_space<vmem>>, vector<8x128xf32>
      %cst_10 = arith.constant dense<0.000000e+00> : vector<128xf32>
      %13 = vector.multi_reduction <add>, %12, %cst_10 [0] : vector<8x128xf32> to vector<128xf32>
      %14 = vector.shape_cast %13 : vector<128xf32> to vector<1x128xf32>
      %15 = vector.shape_cast %14 : vector<1x128xf32> to vector<1x1x128xf32>
      %c0_11 = arith.constant 0 : index
      %c0_12 = arith.constant 0 : index
      %c0_13 = arith.constant 0 : index
      %16 = vector.load %arg3[%c0_11, %c0_12, %c0_13] : memref<1x1x128xf32, #tpu.memory_space<vmem>>, vector<1x1x128xf32>
      tpu.vector_store %arg3[%c0_11, %c0_12, %c0_13], %15 {strides = array<i32>} : memref<1x1x128xf32, #tpu.memory_space<vmem>>, vector<1x1x128xf32>,
    } else {
    }
    return
  }
  func.func @transform_0(%arg0: i32, %arg1: i32) -> (i32, i32) {
    %c1_i32 = arith.constant 1 : i32
    %0 = arith.muli %arg0, %c1_i32 : i32
    %1 = arith.addi %0, %arg1 : i32
    %c0_i32 = arith.constant 0 : i32
    %c0_i32_0 = arith.constant 0 : i32
    return %1, %c0_i32 : i32, i32
  }
  func.func @transform_1(%arg0: i32, %arg1: i32) -> (i32, i32, i32) {
    %c0_i32 = arith.constant 0 : i32
    %c0_i32_0 = arith.constant 0 : i32
    %c0_i32_1 = arith.constant 0 : i32
    return %arg0, %c0_i32, %c0_i32_0 : i32, i32, i32
  }
}

</mosaic_0001>

<bundles_post_ra>
// kernel: tpu_custom_call.1
= control target key start
LH: loop header
LB: loop body
LE: loop exit
PB: predicated region body
PF: predicated region fallthrough
CT: control target
= control target key end

     0   :  { %6 = vsyncpa [#allocation4], 0  ;;  %s158_s0 = inlined_call_operand.hbm [shape: f32[64,128], index: 0, kind: input, shape index: {}]   ;;  %s159_s1 = inlined_call_operand.hbm [shape: f32[1,1,128], index: 1, kind: output, shape index: {}]  }
   0x1   :  { %7 = vsyncpa [#allocation5], 0  ;;  %s16_s8 = sshll.u32 %s158_s0, 4  ;;  %s138_s9 = smov [#allocation3]   ;;  %s17_s8 = int_to_ptr.hbm [resolvable:$true] %s16_s8 }
   0x2   :  { %s18_s10 = sshll.u32 %s138_s9, 4  ;;  %s139_s11 = smov 128   ;;  %s19_s10 = int_to_ptr.vmem [resolvable:$true] %s18_s10 }
   0x3   :  { %s140_s12 = smov 8  }
   0x4   :  { %24 = dma.hbm_to_vmem [thread:$0]  %s17_s8, 1024, %s19_s10, [#allocation4], %s139_s11, %s139_s11, %s140_s12  }
   0x5   :  { %134 = dma.done.wait [#allocation4], 1024  }
   0x6   :  { %135 = vsyncadd [#allocation4], 4294966272  ;;  %v36_v0 = vld [vmem:[#allocation3] sm:$0xff]  ;;  %v37_v1 = vld [vmem:[#allocation3 + $0x8] sm:$0xff]  ;;  %s141_s0 = smov [#allocation6]   ;;  %s72_s16 = sshll.u32 %s159_s1, 4  ;;  %s73_s16 = int_to_ptr.hbm [resolvable:$true] %s72_s16 }
   0x7   :  { %v38_v2 = vld [vmem:[#allocation3 + $0x10] sm:$0xff]  ;;  %v45_v3 = vadd.f32 %v37_v1, %v36_v0  ;;  %v39_v4 = vld [vmem:[#allocation3 + $0x18] sm:$0xff]  ;;  %v40_v6 = vld [vmem:[#allocation3 + $0x20] sm:$0xff]  ;;  %s70_s13 = sshll.u32 %s141_s0, 4  ;;  %s71_s13 = int_to_ptr.vmem [resolvable:$true] %s70_s13 }
   0x8   :  { %v41_v8 = vld [vmem:[#allocation3 + $0x28] sm:$0xff]  ;;  %v42_v10 = vld [vmem:[#allocation3 + $0x30] sm:$0xff]  ;;  %v43_v12 = vld [vmem:[#allocation3 + $0x38] sm:$0xff] }
   0x9   :  { %v46_v5 = vadd.f32 %v45_v3, %v38_v2 }
   0xb   :  { %v47_v7 = vadd.f32 %v46_v5, %v39_v4 }
   0xd   :  { %v48_v9 = vadd.f32 %v47_v7, %v40_v6 }
   0xf   :  { %v49_v11 = vadd.f32 %v48_v9, %v41_v8 }
  0x11   :  { %v50_v13 = vadd.f32 %v49_v11, %v42_v10 }
  0x13   :  { %v51_v14 = vadd.f32 %v50_v13, %v43_v12 }
  0x15   :  { %v58_v15 = vrot.slane %v51_v14, 4 }
  0x17   :  { %v59_v16 = vadd.f32 %v58_v15, %v51_v14 }
  0x19   :  { %v60_v17 = vrot.slane %v59_v16, 2 }
  0x1b   :  { %v61_v18 = vadd.f32 %v60_v17, %v59_v16 }
  0x1d   :  { %v62_v19 = vrot.slane %v61_v18, 1 }
  0x1f   :  { %v63_v20 = vadd.f32 %v62_v19, %v61_v18 }
  0x21   :  { %64 = vst [vmem:[#allocation6] sm:$0x1] %v63_v20 }
  0x22   :  { %75 = dma.vmem_to_hbm [thread:$0]  %s71_s13, 16, %s73_s16, [#allocation5]  }
  0x23   :  { %136 = dma.done.wait [#allocation5], 16  }
  0x24   :  { %137 = vsyncadd [#allocation5], 4294967280 }
  0x25   :  { %80 = vsyncpa [#allocation4], 1 }
  0x26   :  { %81 = vsyncpa [#allocation5], 1 }

</bundles_post_ra>
